<compile_context>
chip_gen: v6e
topology: v6e:2x2x1
jax: 0.10.0
libtpu: 0.0.40
codegen_flags: <defaults>
</compile_context>

<pallas_src>
import jax
import jax.numpy as jnp
from jax.experimental import pallas as pl
from jax.experimental.pallas import tpu as pltpu


def conv3x3_band_kernel(x_ref, w_ref, b_ref, o_ref):
    """Fused 3x3 conv (3 banded matmuls) + bias + ReLU.

    x_ref: (bpb, H+2, Cin*(W+2))  zero-padded row slab for bpb images
    w_ref: (3,  Cin*(W+2), W*Cout) per-kernel-row weight bands (VMEM resident)
    b_ref: (1,  W*Cout)            f32 bias broadcast row (VMEM resident)
    o_ref: (bpb*H, W*Cout)         lane-dense output rows
    """
    bpb, hp2, kb = x_ref.shape
    h = hp2 - 2
    wc = o_ref.shape[-1]
    acc = jnp.zeros((bpb * h, wc), jnp.float32)
    for kh in range(3):  # static unroll: 3 MXU passes over sublane-shifted windows
        x_kh = x_ref[:, kh:kh + h, :].reshape(bpb * h, kb)
        acc = acc + jnp.dot(x_kh, w_ref[kh], preferred_element_type=jnp.float32)
    acc = acc + b_ref[...]                      # bias: broadcast VPU add
    o_ref[...] = jnp.maximum(acc, 0.0).astype(o_ref.dtype)


def pack_band_weights(weight, bias, W, compute_dtype=jnp.float32):
    """OIHW (Cout, Cin, 3, 3) weights + (Cout,) bias -> banded matmul operands.

    Returns:
      wb:       (3, Cin*(W+2), W*Cout); wb[kh, ci*(W+2)+p, w*Cout+co] equals
                weight[co, ci, kh, kw] iff p == w + kw, else 0.
      bias_row: (1, W*Cout) f32; column w*Cout+co -> bias[co].

    Scatter-free (eye / einsum / pad).  Weights are static: call ONCE at module
    init and reuse -- this is intentionally outside the per-call hot path.
    """
    Cout, Cin, KH, KW = weight.shape
    eye = jnp.eye(W, dtype=weight.dtype)                       # (W_out, W_out)
    bands = []
    for kh in range(KH):
        band = jnp.zeros((Cin, W + 2, W, Cout), weight.dtype)
        for kw in range(KW):
            # shift[p, w] = 1 iff padded column p == w + kw
            shift = jnp.pad(eye, ((kw, KW - 1 - kw), (0, 0)))  # (W+2, W)
            band = band + jnp.einsum("pq,oi->ipqo", shift, weight[:, :, kh, kw])
        bands.append(band.reshape(Cin * (W + 2), W * Cout))
    wb = jnp.stack(bands, axis=0).astype(compute_dtype)        # (3, KB, WC)
    bias_row = jnp.tile(bias.astype(jnp.float32), W).reshape(1, W * Cout)
    return wb, bias_row


def _pad_row_slab(x_nchw):
    """(N, Cin, H, W) -> (N, H+2, Cin*(W+2)); lane index = ci*(W+2) + w."""
    N, Cin, H, W = x_nchw.shape
    xp = jnp.pad(x_nchw, ((0, 0), (0, 0), (1, 1), (1, 1)))     # (N, Cin, H+2, W+2)
    xp = jnp.transpose(xp, (0, 2, 1, 3))                       # (N, H+2, Cin, W+2)
    return xp.reshape(N, H + 2, Cin * (W + 2))


def _pick_batch_per_block(N, H, target_rows=256):
    """Images per grid step.  Fold the whole batch into one step unless blocks
    can still carry >= target_rows rows (keeps each MXU pass well filled and
    avoids splitting tiny work across TensorCores / grid steps).  Only exact
    divisors of N (no dropped remainder) with sublane-aligned bpb*H are used."""
    if N * H <= target_rows:
        return N
    for d in range(1, N + 1):
        if N % d == 0 and d * H >= target_rows and (d * H) % 8 == 0:
            return d
    return N


@jax.jit
def up_conv1_apply(x_nchw, wb, bias_row):
    """Hot path: 3x3 conv (pad=1) + bias + ReLU using pre-packed weight bands.

    x_nchw: (N, Cin, H, W); wb: (3, Cin*(W+2), W*Cout) f32/bf16 (compute dtype);
    bias_row: (1, W*Cout) f32.  Returns (N, Cout, H, W) in x's dtype.
    """
    N, Cin, H, W = x_nchw.shape
    KB = Cin * (W + 2)
    WC = wb.shape[-1]
    Cout = WC // W
    compute_dtype = wb.dtype

    slab = _pad_row_slab(x_nchw).astype(compute_dtype)         # (N, H+2, KB)

    bpb = _pick_batch_per_block(N, H)
    grid = (N // bpb,)
    rows = bpb * H

    # --- VMEM budgeting: the banded weight grows ~3*W^2*Cin*Cout bytes -------
    itm = jnp.dtype(compute_dtype).itemsize
    wb_bytes = 3 * KB * WC * itm
    x_blk_bytes = bpb * (H + 2) * KB * itm
    o_blk_bytes = rows * WC * jnp.dtype(x_nchw.dtype).itemsize
    est_bytes = 2 * (x_blk_bytes + o_blk_bytes + wb_bytes + WC * 4)  # default 2-buf
    if wb_bytes > (24 << 20):
        # NOTE: beyond this, tile the bands over (K, output-column) grid axes
        # with an f32 accumulator scratch (P3 pattern) instead of keeping the
        # whole slab resident -- not needed at these shapes.
        raise NotImplementedError(
            "banded weight slab exceeds the VMEM-resident budget; retile it")
    vmem_limit = None
    if est_bytes > (24 << 20):
        vmem_limit = int(min(max(est_bytes * 5 // 4, 32 << 20), 48 << 20))

    out2d = pl.pallas_call(
        conv3x3_band_kernel,
        out_shape=jax.ShapeDtypeStruct((N * H, WC), x_nchw.dtype),
        grid_spec=pltpu.PrefetchScalarGridSpec(
            num_scalar_prefetch=0,
            grid=grid,
            in_specs=[
                # per-step slab of bpb images (trailing dims = full array dims)
                pl.BlockSpec((bpb, H + 2, KB), lambda i: (i, 0, 0)),
                # weight bands + bias row: constant index_map -> DMA'd once,
                # VMEM-resident across all grid steps (no re-fetch).
                pl.BlockSpec((3, KB, WC), lambda i: (0, 0, 0)),
                pl.BlockSpec((1, WC), lambda i: (0, 0)),
            ],
            out_specs=pl.BlockSpec((rows, WC), lambda i: (i, 0)),
        ),
        compiler_params=pltpu.CompilerParams(
            dimension_semantics=("parallel",),
            vmem_limit_bytes=vmem_limit,
        ),
    )(slab, wb, bias_row)

    # Lane-dense (N*H, W*Cout) -> NCHW only to match the PyTorch interface.
    # Consumers that accept NHWC / (N*H, W*C) slabs should skip this transpose
    # (pure layout cost).
    out_nhwc = out2d.reshape(N, H, W, Cout)
    return jnp.transpose(out_nhwc, (0, 3, 1, 2))


def up_conv1_forward(x_nchw, weight, bias, compute_dtype=jnp.float32):
    """Convenience wrapper: pack (init-time cost) then apply (hot path)."""
    W = x_nchw.shape[-1]
    wb, bias_row = pack_band_weights(weight, bias, W, compute_dtype)
    return up_conv1_apply(x_nchw, wb, bias_row)


def _reference(x_nchw, weight, bias):
    """Pure-JAX reference (NCHW conv, pad=1) + bias + ReLU."""
    out = jax.lax.conv_general_dilated(
        x_nchw, weight,
        window_strides=(1, 1),
        padding=((1, 1), (1, 1)),
        dimension_numbers=("NCHW", "OIHW", "NCHW"),
    )
    return jnp.maximum(out + bias.reshape(1, -1, 1, 1), 0.0)


if __name__ == "__main__":
    key = jax.random.PRNGKey(0)
    k_x, k_w, k_b = jax.random.split(key, 3)

    N, Cin, Cout, H, W = 2, 4, 8, 16, 16

    x = jax.random.normal(k_x, (N, Cin, H, W), dtype=jnp.float32)
    # Deterministic synthetic parameters (Conv2d(ch_in=4, ch_out=8, k=3, bias=True)).
    fan_in = Cin * 3 * 3
    bound = 1.0 / (fan_in ** 0.5)
    weight = jax.random.uniform(k_w, (Cout, Cin, 3, 3), jnp.float32, -bound, bound)
    bias = jax.random.uniform(k_b, (Cout,), jnp.float32, -bound, bound)

    # ---- f32 path: exact-parity check against the f32 reference -------------
    wb32, bias_row = pack_band_weights(weight, bias, W, jnp.float32)   # init-time
    out = jax.block_until_ready(up_conv1_apply(x, wb32, bias_row))
    ref = jax.block_until_ready(_reference(x, weight, bias))
    assert out.shape == (N, Cout, H, W)
    assert jnp.allclose(out, ref, atol=1e-4, rtol=1e-4)

    # ---- bf16 fast path (half DMA bytes, native MXU; f32 accumulation) ------
    wb16, bias_row16 = pack_band_weights(weight, bias, W, jnp.bfloat16)
    out16 = jax.block_until_ready(up_conv1_apply(x, wb16, bias_row16))
    ref16 = _reference(x.astype(jnp.bfloat16).astype(jnp.float32),
                       weight.astype(jnp.bfloat16).astype(jnp.float32), bias)
    assert jnp.allclose(out16, jax.block_until_ready(ref16), atol=1e-2, rtol=1e-2)

    print("KERNEL_OK")
</pallas_src>

<mosaic_0001>
module attributes {stable_mosaic.version = 11 : i64} {
  func.func @conv3x3_band_kernel(%arg0: i32, %arg1: memref<2x18x72xf32, #tpu.memory_space<vmem>>, %arg2: memref<3x72x128xf32, #tpu.memory_space<vmem>>, %arg3: memref<1x128xf32, #tpu.memory_space<vmem>>, %arg4: memref<32x128xf32, #tpu.memory_space<vmem>>) attributes {dimension_semantics = [#tpu.dimension_semantics<parallel>], iteration_bounds = array<i64: 1>, scalar_prefetch = 0 : i64, scratch_operands = 0 : i64, tpu.core_type = #tpu.core_type<tc>, window_params = [{transform_indices = @transform_0, window_bounds = array<i64: 2, 18, 72>}, {pipeline_mode = #tpu.pipeline_mode<synchronous>, transform_indices = @transform_1, window_bounds = array<i64: 3, 72, 128>}, {pipeline_mode = #tpu.pipeline_mode<synchronous>, transform_indices = @transform_2, window_bounds = array<i64: 1, 128>}, {transform_indices = @transform_3, window_bounds = array<i64: 32, 128>}]} {
    %cst = arith.constant 0.000000e+00 : f32
    %0 = vector.broadcast %cst : f32 to vector<32x128xf32>
    %c0 = arith.constant 0 : index
    %c0_0 = arith.constant 0 : index
    %c0_1 = arith.constant 0 : index
    %1 = vector.load %arg1[%c0, %c0_0, %c0_1] : memref<2x18x72xf32, #tpu.memory_space<vmem>>, vector<2x16x72xf32>
    %2 = vector.shape_cast %1 : vector<2x16x72xf32> to vector<32x72xf32>
    %c0_2 = arith.constant 0 : index
    %c0_3 = arith.constant 0 : index
    %c0_4 = arith.constant 0 : index
    %3 = vector.load %arg2[%c0_2, %c0_3, %c0_4] : memref<3x72x128xf32, #tpu.memory_space<vmem>>, vector<1x72x128xf32>
    %4 = vector.shape_cast %3 : vector<1x72x128xf32> to vector<72x128xf32>
    %cst_5 = arith.constant dense<0.000000e+00> : vector<32x128xf32>
    %5 = tpu.matmul %2, %4, %cst_5 {dimension_numbers = #tpu.dot_dimension_numbers<[1], [0], [0], [1], [0, 0, 1, 1], [], []>} : vector<32x72xf32>, vector<72x128xf32>, vector<32x128xf32> -> vector<32x128xf32>
    %6 = arith.addf %0, %5 : vector<32x128xf32>
    %c0_6 = arith.constant 0 : index
    %c1 = arith.constant 1 : index
    %c0_7 = arith.constant 0 : index
    %7 = vector.load %arg1[%c0_6, %c1, %c0_7] : memref<2x18x72xf32, #tpu.memory_space<vmem>>, vector<2x16x72xf32>
    %8 = vector.shape_cast %7 : vector<2x16x72xf32> to vector<32x72xf32>
    %c1_8 = arith.constant 1 : index
    %c0_9 = arith.constant 0 : index
    %c0_10 = arith.constant 0 : index
    %9 = vector.load %arg2[%c1_8, %c0_9, %c0_10] : memref<3x72x128xf32, #tpu.memory_space<vmem>>, vector<1x72x128xf32>
    %10 = vector.shape_cast %9 : vector<1x72x128xf32> to vector<72x128xf32>
    %cst_11 = arith.constant dense<0.000000e+00> : vector<32x128xf32>
    %11 = tpu.matmul %8, %10, %cst_11 {dimension_numbers = #tpu.dot_dimension_numbers<[1], [0], [0], [1], [0, 0, 1, 1], [], []>} : vector<32x72xf32>, vector<72x128xf32>, vector<32x128xf32> -> vector<32x128xf32>
    %12 = arith.addf %6, %11 : vector<32x128xf32>
    %c0_12 = arith.constant 0 : index
    %c2 = arith.constant 2 : index
    %c0_13 = arith.constant 0 : index
    %13 = vector.load %arg1[%c0_12, %c2, %c0_13] : memref<2x18x72xf32, #tpu.memory_space<vmem>>, vector<2x16x72xf32>
    %14 = vector.shape_cast %13 : vector<2x16x72xf32> to vector<32x72xf32>
    %c2_14 = arith.constant 2 : index
    %c0_15 = arith.constant 0 : index
    %c0_16 = arith.constant 0 : index
    %15 = vector.load %arg2[%c2_14, %c0_15, %c0_16] : memref<3x72x128xf32, #tpu.memory_space<vmem>>, vector<1x72x128xf32>
    %16 = vector.shape_cast %15 : vector<1x72x128xf32> to vector<72x128xf32>
    %cst_17 = arith.constant dense<0.000000e+00> : vector<32x128xf32>
    %17 = tpu.matmul %14, %16, %cst_17 {dimension_numbers = #tpu.dot_dimension_numbers<[1], [0], [0], [1], [0, 0, 1, 1], [], []>} : vector<32x72xf32>, vector<72x128xf32>, vector<32x128xf32> -> vector<32x128xf32>
    %18 = arith.addf %12, %17 : vector<32x128xf32>
    %c0_18 = arith.constant 0 : index
    %c0_19 = arith.constant 0 : index
    %19 = vector.load %arg3[%c0_18, %c0_19] : memref<1x128xf32, #tpu.memory_space<vmem>>, vector<1x128xf32>
    %20 = vector.broadcast %19 : vector<1x128xf32> to vector<32x128xf32>
    %21 = arith.addf %18, %20 : vector<32x128xf32>
    %cst_20 = arith.constant 0.000000e+00 : f32
    %22 = vector.broadcast %cst_20 : f32 to vector<32x128xf32>
    %23 = arith.maximumf %21, %22 : vector<32x128xf32>
    %c0_21 = arith.constant 0 : index
    %c0_22 = arith.constant 0 : index
    %24 = vector.load %arg4[%c0_21, %c0_22] : memref<32x128xf32, #tpu.memory_space<vmem>>, vector<32x128xf32>
    tpu.vector_store %arg4[%c0_21, %c0_22], %23 {strides = array<i32>} : memref<32x128xf32, #tpu.memory_space<vmem>>, vector<32x128xf32>,
    return
  }
  func.func @transform_0(%arg0: i32) -> (i32, i32, i32) {
    %c0_i32 = arith.constant 0 : i32
    %c0_i32_0 = arith.constant 0 : i32
    %c0_i32_1 = arith.constant 0 : i32
    return %arg0, %c0_i32, %c0_i32_0 : i32, i32, i32
  }
  func.func @transform_1(%arg0: i32) -> (i32, i32, i32) {
    %c0_i32 = arith.constant 0 : i32
    %c0_i32_0 = arith.constant 0 : i32
    %c0_i32_1 = arith.constant 0 : i32
    %c0_i32_2 = arith.constant 0 : i32
    return %c0_i32, %c0_i32_0, %c0_i32_1 : i32, i32, i32
  }
  func.func @transform_2(%arg0: i32) -> (i32, i32) {
    %c0_i32 = arith.constant 0 : i32
    %c0_i32_0 = arith.constant 0 : i32
    %c0_i32_1 = arith.constant 0 : i32
    return %c0_i32, %c0_i32_0 : i32, i32
  }
  func.func @transform_3(%arg0: i32) -> (i32, i32) {
    %c0_i32 = arith.constant 0 : i32
    %c0_i32_0 = arith.constant 0 : i32
    return %arg0, %c0_i32 : i32, i32
  }
}

</mosaic_0001>

<bundles_post_ra>
// kernel: up_conv1_apply.1
= control target key start
LH: loop header
LB: loop body
LE: loop exit
PB: predicated region body
PF: predicated region fallthrough
CT: control target
= control target key end

     0   :  { %vm41_vm0 = vcmask 588800   ;;  %s698_s1 = inlined_call_operand.vmem [shape: f32[3,72,128], index: 1, kind: input, shape index: {}]   ;;  %s699_s0 = inlined_call_operand.vmem [shape: f32[2,18,72], index: 0, kind: input, shape index: {}]   ;;  %s700_s2 = inlined_call_operand.vmem [shape: f32[1,128], index: 2, kind: input, shape index: {}]   ;;  %s701_s3 = inlined_call_operand.vmem [shape: f32[32,128], index: 3, kind: output, shape index: {}]  }
   0x1   :  { %v382_v0 = vld [vmem:[%s698_s1 + $0x88] sm:$0xff]  ;;  %v26_v1 = vld [vmem:[%s698_s1 + $0x40] sm:$0xff]  ;;  %v25_v3 = vld [vmem:[%s698_s1 + $0x38] sm:$0xff] }
   0x2   :  { %v381_v2 = vld [vmem:[%s698_s1 + $0x80] sm:$0xff]  ;;  %444 = vmatprep.subr.mxu0 %v382_v0  ;;  %468 = vmatprep.subr.mxu1 %v26_v1  ;;  %v380_v4 = vld [vmem:[%s698_s1 + $0x78] sm:$0xff]  ;;  %v24_v5 = vld [vmem:[%s698_s1 + $0x30] sm:$0xff] }
   0x3   :  { %445 = vmatpush3.msra.mxu0 %v382_v0  ;;  %469 = vmatpush3.msra.mxu1 %v26_v1  ;;  %v379_v6 = vld [vmem:[%s698_s1 + $0x70] sm:$0xff]  ;;  %v23_v7 = vld [vmem:[%s698_s1 + $0x28] sm:$0xff]  ;;  %v22_v9 = vld [vmem:[%s698_s1 + $0x20] sm:$0xff] }
   0x4   :  { %446 = vmatprep.subr.mxu0 %v381_v2  ;;  %470 = vmatprep.subr.mxu1 %v25_v3  ;;  %v378_v8 = vld [vmem:[%s698_s1 + $0x68] sm:$0xff]  ;;  %v377_v10 = vld [vmem:[%s698_s1 + $0x60] sm:$0xff]  ;;  %v21_v11 = vld [vmem:[%s698_s1 + $0x18] sm:$0xff] }
   0x5   :  { %447 = vmatpush3.msra.mxu0 %v381_v2  ;;  %471 = vmatpush3.msra.mxu1 %v25_v3  ;;  %v376_v12 = vld [vmem:[%s698_s1 + $0x58] sm:$0xff]  ;;  %v20_v13 = vld [vmem:[%s698_s1 + $0x10] sm:$0xff]  ;;  %v19_v15 = vld [vmem:[%s698_s1 + $0x8] sm:$0xff] }
   0x6   :  { %448 = vmatprep.subr.mxu0 %v380_v4  ;;  %472 = vmatprep.subr.mxu1 %v24_v5  ;;  %v375_v14 = vld [vmem:[%s698_s1 + $0x50] sm:$0xff]  ;;  %v374_v16 = vld [vmem:[%s698_s1 + $0x48] sm:$0xff]  ;;  %v18_v17 = vld [vmem:[%s698_s1] sm:$0xff] }
   0x7   :  { %449 = vmatpush3.msra.mxu0 %v380_v4  ;;  %473 = vmatpush3.msra.mxu1 %v24_v5  ;;  %v27_v18 = vld [vmem:[%s699_s0 + $0x1] sm:$0xff]  ;;  %v28_v20 = vld [vmem:[%s699_s0 + $0x9] sm:$0xff]  ;;  %v396_v25 = vld [vmem:[%s698_s1 + $0xb8] sm:$0xff] }
   0x8   :  { %450 = vmatprep.subr.mxu0 %v379_v6  ;;  %474 = vmatprep.subr.mxu1 %v23_v7  ;;  %v14_v19 = vld [vmem:[%s699_s0] sm:$0xff]  ;;  %v15_v21 = vld [vmem:[%s699_s0 + $0x8] sm:$0xff]  ;;  %v399_v22 = vld [vmem:[%s698_s1 + $0xd0] sm:$0xff] }
   0x9   :  { %451 = vmatpush3.msra.mxu0 %v379_v6  ;;  %475 = vmatpush3.msra.mxu1 %v23_v7  ;;  %v398_v23 = vld [vmem:[%s698_s1 + $0xc8] sm:$0xff]  ;;  %v397_v24 = vld [vmem:[%s698_s1 + $0xc0] sm:$0xff]  ;;  %v395_v26 = vld [vmem:[%s698_s1 + $0xb0] sm:$0xff] }
   0xa   :  { %452 = vmatprep.subr.mxu0 %v378_v8  ;;  %476 = vmatprep.subr.mxu1 %v22_v9  ;;  %v394_v27 = vld [vmem:[%s698_s1 + $0xa8] sm:$0xff]  ;;  %v29_v28 = vld [vmem:[%s699_s0 + $0x19] sm:$0xff]  ;;  %v391_v34 = vld [vmem:[%s698_s1 + $0x90] sm:$0xff] }
   0xb   :  { %453 = vmatpush3.msra.mxu0 %v378_v8  ;;  %477 = vmatpush3.msra.mxu1 %v22_v9  ;;  %v16_v29 = vld [vmem:[%s699_s0 + $0x18] sm:$0xff]  ;;  %v30_v30 = vld [vmem:[%s699_s0 + $0x21] sm:$0xff]  ;;  %v237_v37 = vld [vmem:[%s699_s0 + $0xa] sm:$0xff] }
   0xc   :  { %454 = vmatprep.subr.mxu0 %v377_v10  ;;  %478 = vmatprep.subr.mxu1 %v21_v11  ;;  %v17_v31 = vld [vmem:[%s699_s0 + $0x20] sm:$0xff]  ;;  %v392_v33 = vld [vmem:[%s698_s1 + $0x98] sm:$0xff] }
   0xd   :  { %455 = vmatpush3.msra.mxu0 %v377_v10  ;;  %479 = vmatpush3.msra.mxu1 %v21_v11  ;;  %v393_v32 = vld [vmem:[%s698_s1 + $0xa0] sm:$0xff] }
   0xe   :  { %456 = vmatprep.subr.mxu0 %v376_v12  ;;  %480 = vmatprep.subr.mxu1 %v20_v13  ;;  %v236_v35 = vld [vmem:[%s699_s0 + $0x2] sm:$0xff]  ;;  %v238_v36 = vld [vmem:[%s699_s0 + $0x1a] sm:$0xff] }
   0xf   :  { %457 = vmatpush3.msra.mxu0 %v376_v12  ;;  %481 = vmatpush3.msra.mxu1 %v20_v13  ;;  %v239_v38 = vld [vmem:[%s699_s0 + $0x22] sm:$0xff]  ;;  %v404_v50 = vld [vmem:[%s700_s2] ss:$0 sm:$0xff] }
  0x10   :  { %458 = vmatprep.subr.mxu0 %v375_v14  ;;  %482 = vmatprep.subr.mxu1 %v19_v15 }
  0x11   :  { %459 = vmatpush3.msra.mxu0 %v375_v14  ;;  %483 = vmatpush3.msra.mxu1 %v19_v15 }
  0x12   :  { %460 = vmatprep.subr.mxu0 %v374_v16  ;;  %484 = vmatprep.subr.mxu1 %v18_v17 }
  0x13   :  { %461 = vmatpush3.msra.mxu0 %v374_v16  ;;  %462 = vmatprep.mubr.msk.f32.mxu0 %vm41_vm0, %v27_v18 }
  0x14   :  { %485 = vmatpush3.msra.mxu1 %v18_v17  ;;  %486 = vmatprep.mubr.msk.f32.mxu1 %vm41_vm0, %v14_v19 }
  0x15   :  { %463 = vmatmul.mubr.msk.f32.vlgmr.msra.gmra.mxu0 %vm41_vm0, %v28_v20  ;;  %487 = vmatmul.mubr.msk.f32.vlgmr.msra.gmra.mxu1 %vm41_vm0, %v15_v21 }
  0x16   :  { %492 = vmatprep.subr.mxu0 %v399_v22  ;;  %516 = vmatprep.subr.mxu1 %v399_v22 }
  0x17   :  { %493 = vmatpush3.msra.mxu0 %v399_v22  ;;  %525 = vmatpush3.msra.mxu1 %v399_v22 }
  0x18   :  { %494 = vmatprep.subr.mxu0 %v398_v23  ;;  %517 = vmatprep.subr.mxu1 %v398_v23 }
  0x19   :  { %495 = vmatpush3.msra.mxu0 %v398_v23  ;;  %526 = vmatpush3.msra.mxu1 %v398_v23 }
  0x1a   :  { %496 = vmatprep.subr.mxu0 %v397_v24  ;;  %518 = vmatprep.subr.mxu1 %v397_v24 }
  0x1b   :  { %497 = vmatpush3.msra.mxu0 %v397_v24  ;;  %527 = vmatpush3.msra.mxu1 %v397_v24 }
  0x1c   :  { %498 = vmatprep.subr.mxu0 %v396_v25  ;;  %519 = vmatprep.subr.mxu1 %v396_v25 }
  0x1d   :  { %499 = vmatpush3.msra.mxu0 %v396_v25  ;;  %528 = vmatpush3.msra.mxu1 %v396_v25 }
  0x1e   :  { %500 = vmatprep.subr.mxu0 %v395_v26  ;;  %520 = vmatprep.subr.mxu1 %v395_v26 }
  0x1f   :  { %501 = vmatpush3.msra.mxu0 %v395_v26  ;;  %529 = vmatpush3.msra.mxu1 %v395_v26 }
  0x20   :  { %502 = vmatprep.subr.mxu0 %v394_v27  ;;  %521 = vmatprep.subr.mxu1 %v394_v27 }
  0x21   :  { %465 = vmatprep.mubr.msk.f32.mxu0 %vm41_vm0, %v29_v28  ;;  %489 = vmatprep.mubr.msk.f32.mxu1 %vm41_vm0, %v16_v29 }
  0x22   :  { %503 = vmatpush3.msra.mxu0 %v394_v27  ;;  %530 = vmatpush3.msra.mxu1 %v394_v27 }
  0x23   :  { %466 = vmatmul.mubr.msk.f32.gmra.mxu0 %vm41_vm0, %v30_v30  ;;  %490 = vmatmul.mubr.msk.f32.gmra.mxu1 %vm41_vm0, %v17_v31 }
  0x24   :  { %504 = vmatprep.subr.mxu0 %v393_v32  ;;  %522 = vmatprep.subr.mxu1 %v393_v32 }
  0x25   :  { %505 = vmatpush3.msra.mxu0 %v393_v32  ;;  %531 = vmatpush3.msra.mxu1 %v393_v32 }
  0x26   :  { %506 = vmatprep.subr.mxu0 %v392_v33  ;;  %523 = vmatprep.subr.mxu1 %v392_v33 }
  0x27   :  { %507 = vmatpush3.msra.mxu0 %v392_v33  ;;  %532 = vmatpush3.msra.mxu1 %v392_v33 }
  0x28   :  { %508 = vmatprep.subr.mxu0 %v391_v34  ;;  %524 = vmatprep.subr.mxu1 %v391_v34 }
  0x29   :  { %509 = vmatpush3.msra.mxu0 %v391_v34  ;;  %533 = vmatpush3.msra.mxu1 %v391_v34 }
  0x2a   :  { %510 = vmatprep.mubr.msk.f32.mxu0 %vm41_vm0, %v236_v35  ;;  %513 = vmatprep.mubr.msk.f32.mxu1 %vm41_vm0, %v238_v36 }
  0x2b   :  { %511 = vmatmul.mubr.msk.f32.vlgmr.msra.gmra.mxu0 %vm41_vm0, %v237_v37  ;;  %514 = vmatmul.mubr.msk.f32.vlgmr.msra.gmra.mxu1 %vm41_vm0, %v239_v38 }
  0xd5   :  { %v464_v39 = vpop.f32.mrf.mxu0  ;;  %v488_v40 = vpop.f32.mrf.mxu1 }
  0xd6   :  { %v223_v47 = vadd.f32 %v488_v40, %v464_v39 }
  0xd7   :  { %v120_v41 = vpop.f32.mrf.mxu0  ;;  %v217_v42 = vpop.f32.mrf.mxu1 }
  0xd8   :  { %v218_v52 = vadd.f32 %v217_v42, %v120_v41 }
  0xe3   :  { %v467_v43 = vpop.f32.mrf.mxu0  ;;  %v491_v44 = vpop.f32.mrf.mxu1 }
  0xe4   :  { %v233_v48 = vadd.f32 %v491_v44, %v467_v43 }
  0xe5   :  { %v130_v45 = vpop.f32.mrf.mxu0  ;;  %v227_v46 = vpop.f32.mrf.mxu1 }
  0xe6   :  { %v228_v53 = vadd.f32 %v227_v46, %v130_v45 }
  0xeb   :  { %v512_v49 = vpop.f32.mrf.mxu0  ;;  %v515_v51 = vpop.f32.mrf.mxu1 }
  0xec   :  { %v348_v54 = vadd.f32 %v512_v49, %v223_v47  ;;  %v350_v55 = vadd.f32 %v515_v51, %v233_v48 }
  0xed   :  { %v328_v56 = vpop.f32.mrf.mxu0  ;;  %v338_v57 = vpop.f32.mrf.mxu1 }
  0xee   :  { %v359_v58 = vadd.f32 %v404_v50, %v348_v54  ;;  %v361_v59 = vadd.f32 %v404_v50, %v350_v55  ;;  %v347_v60 = vadd.f32 %v328_v56, %v218_v52  ;;  %v349_v61 = vadd.f32 %v338_v57, %v228_v53 }
  0xf0   :  { %v363_v62 = vmax.f32 %v359_v58, 0.0  ;;  %v365_v63 = vmax.f32 %v361_v59, 0.0  ;;  %v358_v0 = vadd.f32 %v404_v50, %v347_v60  ;;  %v360_v1 = vadd.f32 %v404_v50, %v349_v61 }
  0xf2   :  { %367 = vst [vmem:[%s701_s3 + $0x8] sm:$0xff] %v363_v62  ;;  %369 = vst [vmem:[%s701_s3 + $0x18] sm:$0xff] %v365_v63  ;;  %v362_v2 = vmax.f32 %v358_v0, 0.0  ;;  %v364_v3 = vmax.f32 %v360_v1, 0.0 }
  0xf4   :  { %366 = vst [vmem:[%s701_s3] sm:$0xff] %v362_v2  ;;  %368 = vst [vmem:[%s701_s3 + $0x10] sm:$0xff] %v364_v3 }

</bundles_post_ra>
